<compile_context>
chip_gen: v7x
topology: tpu7x:2x2x1
jax: 0.10.0
libtpu: 0.0.40
codegen_flags: <defaults>
</compile_context>

<pallas_src>
import math

import jax
import jax.numpy as jnp
from jax import lax
from jax.experimental import pallas as pl
from jax.experimental.pallas import tpu as pltpu


def _round_up(v, m):
    return ((v + m - 1) // m) * m


def mlp_kernel(x_ref, w1t_ref, b1_ref, w2_ref, b2_ref, w3_ref, b3_ref, o_ref):
    # Stream x in whatever dtype it lives in HBM; cast after load (no-op for f32).
    x = x_ref[...].astype(jnp.float32)                        # [tb, D]

    # Layer 1, natural orientation: canonical [M,K]@[K,N] -> no transpose of the
    # large x tile (w1 is stored pre-transposed as [D, 16]).
    h1 = lax.dot_general(x, w1t_ref[...], (((1,), (0,)), ((), ())),
                         preferred_element_type=jnp.float32)   # [tb, 16]
    h1 = jnp.maximum(h1 + b1_ref[...], 0.0)

    # Put the batch on the 128-wide lane axis with a small [tb,16] transpose
    # (XLU work, hidden under the x DMA) so layers 2/3 + the store are lane-dense.
    h1_t = jnp.transpose(h1)                                   # [16, tb]

    h2_t = lax.dot_general(w2_ref[...], h1_t, (((1,), (0,)), ((), ())),
                           preferred_element_type=jnp.float32)  # [8, tb]
    h2_t = jnp.maximum(h2_t + b2_ref[...], 0.0)

    h3_t = lax.dot_general(w3_ref[...], h2_t, (((1,), (0,)), ((), ())),
                           preferred_element_type=jnp.float32)  # [1, tb]
    o_ref[...] = jax.nn.sigmoid(h3_t + b3_ref[...]).astype(o_ref.dtype)


def employee_task_model(x, params, *, block_batch=None):
    """Fused forward pass. x: [B, input_dim] -> [B, 1] float32.

    No wrapper-side astype/pad passes over x; the ragged last batch tile is
    handled by Pallas boundary masking."""
    w1t, b1, w2, b2, w3, b3 = params
    B, D = x.shape

    # Batch tile: ~2 MiB of x per tile (double-buffered), 512-aligned, and with
    # at least 2 tiles when the batch is big enough (v7x megacore balance).
    if B <= 512:
        tb = B                          # single full-array block, always layout-legal
    else:
        row_bytes = D * x.dtype.itemsize
        budget = 2 * 1024 * 1024
        tb = max(512, (budget // row_bytes) // 512 * 512)
        tb = min(tb, _round_up(pl.cdiv(B, 2), 512))
        if block_batch is not None:
            tb = min(tb, max(512, _round_up(int(block_batch), 512)))
    grid = (pl.cdiv(B, tb),)

    def const_spec(a):
        # Full-array block, constant index_map -> DMA'd once, VMEM-resident.
        return pl.BlockSpec(a.shape, lambda i: (0, 0))

    param_bytes = sum(int(a.size) * a.dtype.itemsize for a in params)
    cost = pl.CostEstimate(
        flops=2 * B * (D * 16 + 16 * 8 + 8 * 1),
        transcendentals=2 * B,                      # sigmoid = exp + reciprocal
        bytes_accessed=B * D * x.dtype.itemsize + B * 4 + param_bytes,
    )

    out_t = pl.pallas_call(
        mlp_kernel,
        out_shape=jax.ShapeDtypeStruct((1, B), jnp.float32),
        grid_spec=pltpu.PrefetchScalarGridSpec(
            num_scalar_prefetch=0,
            grid=grid,
            in_specs=[
                pl.BlockSpec((tb, D), lambda i: (i, 0)),      # streamed batch tile
                const_spec(w1t), const_spec(b1),
                const_spec(w2), const_spec(b2),
                const_spec(w3), const_spec(b3),
            ],
            out_specs=pl.BlockSpec((1, tb), lambda i: (0, i)),  # lane-dense store
        ),
        compiler_params=pltpu.CompilerParams(
            dimension_semantics=("parallel",),       # split batch grid across TCs (v7x)
            vmem_limit_bytes=32 * 1024 * 1024,       # headroom over v5e's 16 MiB default
        ),
        cost_estimate=cost,
    )(x, w1t, b1, w2, b2, w3, b3)

    return out_t.reshape(B, 1)


def init_params(key, input_dim):
    """PyTorch nn.Linear default init U(-1/sqrt(fan_in), +1/sqrt(fan_in)), all f32.
    Kernel layouts: w1 pre-transposed to [in, 16] (layer 1 runs in natural
    orientation), w2/w3 in native [out, in] (layers 2/3 run transposed);
    b1 as a [1, 16] row, b2 as an [8, 1] column, b3 as [1, 1]."""
    def linear(k, fan_in, fan_out):
        kw, kb = jax.random.split(k)
        bound = 1.0 / math.sqrt(fan_in)
        w = jax.random.uniform(kw, (fan_out, fan_in), jnp.float32, -bound, bound)
        b = jax.random.uniform(kb, (fan_out,), jnp.float32, -bound, bound)
        return w, b

    k1, k2, k3 = jax.random.split(key, 3)
    w1, b1 = linear(k1, input_dim, 16)
    w2, b2 = linear(k2, 16, 8)
    w3, b3 = linear(k3, 8, 1)
    return (w1.T, b1.reshape(1, 16),
            w2, b2.reshape(8, 1),
            w3, b3.reshape(1, 1))


def reference_forward(x, params):
    """Plain-JAX f32 reference with PyTorch EmployeeTaskModel semantics."""
    w1t, b1, w2, b2, w3, b3 = params
    h1 = jnp.maximum(x @ w1t + b1, 0.0)          # [B, 16]
    h2 = jnp.maximum(h1 @ w2.T + b2.T, 0.0)      # [B, 8]
    h3 = h2 @ w3.T + b3.T                        # [B, 1]
    return jax.nn.sigmoid(h3)


if __name__ == "__main__":
    key = jax.random.PRNGKey(0)
    k_params, k_x1, k_x2 = jax.random.split(key, 3)

    input_dim = 32
    params = init_params(k_params, input_dim)

    # Small single-block check (full-array block, B not a multiple of 128).
    x_small = jax.random.normal(k_x1, (8, input_dim), jnp.float32)
    out_small = jax.block_until_ready(employee_task_model(x_small, params))
    ref_small = reference_forward(x_small, params)
    assert out_small.shape == (8, 1), out_small.shape
    assert jnp.allclose(out_small, ref_small, atol=5e-3, rtol=1e-3), "mismatch (small)"

    # Multi-tile check with a ragged last tile (520 = 512 + 8; no wrapper pad).
    x_big = jax.random.normal(k_x2, (520, input_dim), jnp.float32)
    out_big = jax.block_until_ready(
        employee_task_model(x_big, params, block_batch=512))
    ref_big = reference_forward(x_big, params)
    assert out_big.shape == (520, 1), out_big.shape
    assert jnp.allclose(out_big, ref_big, atol=5e-3, rtol=1e-3), "mismatch (tiled)"

    print("KERNEL_OK")
</pallas_src>

<mosaic_0001>
module attributes {stable_mosaic.version = 11 : i64} {
  func.func @mlp_kernel(%arg0: i32, %arg1: memref<8x32xf32, #tpu.memory_space<vmem>>, %arg2: memref<32x16xf32, #tpu.memory_space<vmem>>, %arg3: memref<1x16xf32, #tpu.memory_space<vmem>>, %arg4: memref<8x16xf32, #tpu.memory_space<vmem>>, %arg5: memref<8x1xf32, #tpu.memory_space<vmem>>, %arg6: memref<1x8xf32, #tpu.memory_space<vmem>>, %arg7: memref<1x1xf32, #tpu.memory_space<vmem>>, %arg8: memref<1x8xf32, #tpu.memory_space<vmem>>) attributes {dimension_semantics = [#tpu.dimension_semantics<parallel>], iteration_bounds = array<i64: 1>, scalar_prefetch = 0 : i64, scratch_operands = 0 : i64, tpu.core_type = #tpu.core_type<tc>, window_params = [{transform_indices = @transform_0, window_bounds = array<i64: 8, 32>}, {pipeline_mode = #tpu.pipeline_mode<synchronous>, transform_indices = @transform_1, window_bounds = array<i64: 32, 16>}, {pipeline_mode = #tpu.pipeline_mode<synchronous>, transform_indices = @transform_2, window_bounds = array<i64: 1, 16>}, {pipeline_mode = #tpu.pipeline_mode<synchronous>, transform_indices = @transform_3, window_bounds = array<i64: 8, 16>}, {pipeline_mode = #tpu.pipeline_mode<synchronous>, transform_indices = @transform_4, window_bounds = array<i64: 8, 1>}, {pipeline_mode = #tpu.pipeline_mode<synchronous>, transform_indices = @transform_5, window_bounds = array<i64: 1, 8>}, {pipeline_mode = #tpu.pipeline_mode<synchronous>, transform_indices = @transform_6, window_bounds = array<i64: 1, 1>}, {transform_indices = @transform_7, window_bounds = array<i64: 1, 8>}]} {
    %c0 = arith.constant 0 : index
    %c0_0 = arith.constant 0 : index
    %0 = vector.load %arg1[%c0, %c0_0] : memref<8x32xf32, #tpu.memory_space<vmem>>, vector<8x32xf32>
    %c0_1 = arith.constant 0 : index
    %c0_2 = arith.constant 0 : index
    %1 = vector.load %arg2[%c0_1, %c0_2] : memref<32x16xf32, #tpu.memory_space<vmem>>, vector<32x16xf32>
    %cst = arith.constant dense<0.000000e+00> : vector<8x16xf32>
    %2 = tpu.matmul %0, %1, %cst {dimension_numbers = #tpu.dot_dimension_numbers<[1], [0], [0], [1], [0, 0, 1, 1], [], []>} : vector<8x32xf32>, vector<32x16xf32>, vector<8x16xf32> -> vector<8x16xf32>
    %c0_3 = arith.constant 0 : index
    %c0_4 = arith.constant 0 : index
    %3 = vector.load %arg3[%c0_3, %c0_4] : memref<1x16xf32, #tpu.memory_space<vmem>>, vector<1x16xf32>
    %4 = vector.broadcast %3 : vector<1x16xf32> to vector<8x16xf32>
    %5 = arith.addf %2, %4 : vector<8x16xf32>
    %cst_5 = arith.constant 0.000000e+00 : f32
    %6 = vector.broadcast %cst_5 : f32 to vector<8x16xf32>
    %7 = arith.maximumf %5, %6 : vector<8x16xf32>
    %8 = tpu.transpose %7, [1, 0] : vector<8x16xf32> -> vector<16x8xf32>
    %c0_6 = arith.constant 0 : index
    %c0_7 = arith.constant 0 : index
    %9 = vector.load %arg4[%c0_6, %c0_7] : memref<8x16xf32, #tpu.memory_space<vmem>>, vector<8x16xf32>
    %cst_8 = arith.constant dense<0.000000e+00> : vector<8x8xf32>
    %10 = tpu.matmul %9, %8, %cst_8 {dimension_numbers = #tpu.dot_dimension_numbers<[1], [0], [0], [1], [0, 0, 1, 1], [], []>} : vector<8x16xf32>, vector<16x8xf32>, vector<8x8xf32> -> vector<8x8xf32>
    %c0_9 = arith.constant 0 : index
    %c0_10 = arith.constant 0 : index
    %11 = vector.load %arg5[%c0_9, %c0_10] : memref<8x1xf32, #tpu.memory_space<vmem>>, vector<8x1xf32>
    %12 = vector.broadcast %11 : vector<8x1xf32> to vector<8x8xf32>
    %13 = arith.addf %10, %12 : vector<8x8xf32>
    %cst_11 = arith.constant 0.000000e+00 : f32
    %14 = vector.broadcast %cst_11 : f32 to vector<8x8xf32>
    %15 = arith.maximumf %13, %14 : vector<8x8xf32>
    %c0_12 = arith.constant 0 : index
    %c0_13 = arith.constant 0 : index
    %16 = vector.load %arg6[%c0_12, %c0_13] : memref<1x8xf32, #tpu.memory_space<vmem>>, vector<1x8xf32>
    %cst_14 = arith.constant dense<0.000000e+00> : vector<1x8xf32>
    %17 = tpu.matmul %16, %15, %cst_14 {dimension_numbers = #tpu.dot_dimension_numbers<[1], [0], [0], [1], [0, 0, 1, 1], [], []>} : vector<1x8xf32>, vector<8x8xf32>, vector<1x8xf32> -> vector<1x8xf32>
    %c0_15 = arith.constant 0 : index
    %c0_16 = arith.constant 0 : index
    %18 = vector.load %arg7[%c0_15, %c0_16] : memref<1x1xf32, #tpu.memory_space<vmem>>, vector<1x1xf32>
    %19 = vector.broadcast %18 : vector<1x1xf32> to vector<1x8xf32>
    %20 = arith.addf %17, %19 : vector<1x8xf32>
    %21 = arith.negf %20 : vector<1x8xf32>
    %22 = math.exp %21 : vector<1x8xf32>
    %cst_17 = arith.constant 1.000000e+00 : f32
    %23 = vector.broadcast %cst_17 : f32 to vector<1x8xf32>
    %24 = arith.addf %23, %22 : vector<1x8xf32>
    %25 = arith.divf %23, %24 : vector<1x8xf32>
    %c0_18 = arith.constant 0 : index
    %c0_19 = arith.constant 0 : index
    %26 = vector.load %arg8[%c0_18, %c0_19] : memref<1x8xf32, #tpu.memory_space<vmem>>, vector<1x8xf32>
    tpu.vector_store %arg8[%c0_18, %c0_19], %25 {strides = array<i32>} : memref<1x8xf32, #tpu.memory_space<vmem>>, vector<1x8xf32>,
    return
  }
  func.func @transform_0(%arg0: i32) -> (i32, i32) {
    %c0_i32 = arith.constant 0 : i32
    %c0_i32_0 = arith.constant 0 : i32
    return %arg0, %c0_i32 : i32, i32
  }
  func.func @transform_1(%arg0: i32) -> (i32, i32) {
    %c0_i32 = arith.constant 0 : i32
    %c0_i32_0 = arith.constant 0 : i32
    %c0_i32_1 = arith.constant 0 : i32
    return %c0_i32, %c0_i32_0 : i32, i32
  }
  func.func @transform_2(%arg0: i32) -> (i32, i32) {
    %c0_i32 = arith.constant 0 : i32
    %c0_i32_0 = arith.constant 0 : i32
    %c0_i32_1 = arith.constant 0 : i32
    return %c0_i32, %c0_i32_0 : i32, i32
  }
  func.func @transform_3(%arg0: i32) -> (i32, i32) {
    %c0_i32 = arith.constant 0 : i32
    %c0_i32_0 = arith.constant 0 : i32
    %c0_i32_1 = arith.constant 0 : i32
    return %c0_i32, %c0_i32_0 : i32, i32
  }
  func.func @transform_4(%arg0: i32) -> (i32, i32) {
    %c0_i32 = arith.constant 0 : i32
    %c0_i32_0 = arith.constant 0 : i32
    %c0_i32_1 = arith.constant 0 : i32
    return %c0_i32, %c0_i32_0 : i32, i32
  }
  func.func @transform_5(%arg0: i32) -> (i32, i32) {
    %c0_i32 = arith.constant 0 : i32
    %c0_i32_0 = arith.constant 0 : i32
    %c0_i32_1 = arith.constant 0 : i32
    return %c0_i32, %c0_i32_0 : i32, i32
  }
  func.func @transform_6(%arg0: i32) -> (i32, i32) {
    %c0_i32 = arith.constant 0 : i32
    %c0_i32_0 = arith.constant 0 : i32
    %c0_i32_1 = arith.constant 0 : i32
    return %c0_i32, %c0_i32_0 : i32, i32
  }
  func.func @transform_7(%arg0: i32) -> (i32, i32) {
    %c0_i32 = arith.constant 0 : i32
    %c0_i32_0 = arith.constant 0 : i32
    return %c0_i32, %arg0 : i32, i32
  }
}

</mosaic_0001>

<bundles_post_ra>
// kernel: tpu_custom_call.1
= control target key start
LH: loop header
LB: loop body
LE: loop exit
PB: predicated region body
PF: predicated region fallthrough
CT: control target
= control target key end

     0   :  { %s474_s0 = inlined_call_operand.vmem [shape: f32[8,32], index: 0, kind: input, shape index: {}]   ;;  %s475_s1 = inlined_call_operand.vmem [shape: f32[32,16], index: 1, kind: input, shape index: {}]   ;;  %s476_s2 = inlined_call_operand.vmem [shape: f32[1,16], index: 2, kind: input, shape index: {}]   ;;  %s477_s3 = inlined_call_operand.vmem [shape: f32[8,16], index: 3, kind: input, shape index: {}]   ;;  %s478_s4 = inlined_call_operand.vmem [shape: f32[8,1], index: 4, kind: input, shape index: {}]   ;;  %s479_s5 = inlined_call_operand.vmem [shape: f32[1,8], index: 5, kind: input, shape index: {}]   ;;  %s480_s6 = inlined_call_operand.<no memory space> [shape: f32[1,1], index: 6, kind: input, shape index: {}]   ;;  %s481_s7 = inlined_call_operand.hbm [shape: f32[1,8], index: 7, kind: output, shape index: {}]  }
   0x1   :  { %v12_v0 = vstv %s480_s6 }
   0x2   :  { %13 = vst [vmem:[#allocation2] sm:$0x1] %v12_v0 }
   0x3   :  { %v30_v1 = vld [vmem:[%s475_s1] sm:$0xff]  ;;  %v31_v2 = vld [vmem:[%s475_s1 + $0x8] sm:$0xff]  ;;  %v32_v3 = vld [vmem:[%s475_s1 + $0x10] sm:$0xff]  ;;  %v384_v4 = vmov 0.0|0.0   ;;  %vm385_vm0 = vmmov 0   ;;  %v386_v7 = vmov 0.0  }
   0x4   :  { %344 = vmatprep.subr.bf16.mxu0 %v384_v4  ;;  %v345_v5 = vpack.c.bf16 %v31_v2, %v30_v1  ;;  %v33_v6 = vld [vmem:[%s475_s1 + $0x18] sm:$0xff]  ;;  %331 = vmatprep.mubr.msk.f32.mxu0 %vm385_vm0, %v386_v7 }
   0x5   :  { %334 = vmatprep.subr.mxu1 %v386_v7  ;;  %336 = vmatprep.mubr.msk.f32.mxu1 %vm385_vm0, %v386_v7 }
   0x6   :  { %14 = vsyncpa [#allocation4], 0  ;;  %346 = vmatpush3.bf16.msra.mxu0 %v345_v5  ;;  %v348_v8 = vpack.c.bf16 %v33_v6, %v32_v3  ;;  %v29_v9 = vld [vmem:[%s474_s0] sm:$0xff]  ;;  %vm41_vm1 = vcmask 261120   ;;  %v387_v11 = vmov 0   ;;  %vm123_vm2 = vcmask 130048  }
   0x7   :  { %347 = vmatprep.subr.bf16.mxu0 %v384_v4  ;;  %v117_v10 = vld [vmem:[%s478_s4] sm:$0xff]  ;;  %355 = vset.pattern.permute.xlu0 %v387_v11  ;;  %vm212_vm3 = vcmask 64512   ;;  %v208_v25 = vlaneseq  ;;  %vm292_vm4 = vcmask 57344  }
   0x8   :  { %120 = vperm.xlu0 %355, %v117_v10   ;;  %v308_v13 = vld [vmem:[%s476_s2] ss:$0 sm:$0xff] }
   0x9   :  { %v202_v12 = vld [vmem:[#allocation2] sm:$0x1]  ;;  %v209_v26 = vshrl.u32 %v208_v25, 7 }
   0xa   :  { %349 = vmatpush3.bf16.msra.mxu0 %v348_v8  ;;  %v116_v18 = vld [vmem:[%s477_s3] sm:$0xff]  ;;  %s388_s3 = smov [#allocation3]  }
   0xb   :  { %v201_v24 = vld [vmem:[%s479_s5] sm:$0x1]  ;;  %v210_v27 = vsub.s32 0, %v209_v26  ;;  %s300_s16 = sshll.u32 %s388_s3, 4  ;;  %s301_s16 = int_to_ptr.vmem [resolvable:$true] %s300_s16 }
   0xc   :  { %205 = vperm.xlu0 %355, %v202_v12   ;;  %s360_s5 = scalar_lea.vmem %s301_s16, 16  ;;  %s364_s17 = scalar_lea.vmem %s301_s16, 32 }
   0xd   :  { %332 = vmatmul.mubr.msk.f32.vlgmr.msra.gmra.mrb[0].mxu0 %vm41_vm1, %v29_v9  ;;  %p361_p0 = scmp.ne.s32.totalorder %s301_s16, %s360_s5  ;;  %p365_p1 = scmp.lt.s32.totalorder %s301_s16, %s301_s16 }
   0xe   :  { %p366_p2 = scmp.lt.s32.totalorder %s364_s17, %s360_s5 }
  0x10   :  { %p367_p3 = por %p366_p2, %p365_p1 }
  0x12   :  { %p368_p4 = pnand %p367_p3, %p361_p0 }
  0x87   :  { %v121_v19 = vpop.permute.xlu0 %120 }
  0x8b   :  { %v206_v28 = vpop.permute.xlu0 %205 }
  0x8c   :  { %v211_v29 = vrot.slane %v206_v28, %v210_v27 }
  0xe0   :  { %v111_v14 = vpop.f32.mrb[0].mxu0 }
  0xe1   :  { %v112_v15 = vadd.f32 %v308_v13, %v111_v14  ;;  %v333_v16 = vpop.f32.mrb[1].mxu0 }
  0xe3   :  { %v115_v17 = vmax.f32 %v112_v15, 0.0 }
  0xe5   :  { %335 = vmatpush3.xpose.msk.msra.mxu1 %vm123_vm2, %v115_v17 }
  0xe6   :  { %339 = vmatprep.subr.mxu1 %v386_v7 }
  0xe8   :  { %337 = vmatmul.mubr.msk.f32.vlgmr.msra.gmra.mrb[0].mxu1 %vm123_vm2, %v116_v18 }
  0xe9   :  { %341 = vmatprep.mubr.msk.f32.mxu1 %vm385_vm0, %v386_v7 }
 0x1bb   :  { %v196_v20 = vpop.f32.mrb[0].mxu1 }
 0x1bc   :  { %v197_v21 = vadd.f32 %v196_v20, %v121_v19  ;;  %v338_v22 = vpop.f32.mrb[1].mxu1 }
 0x1be   :  { %v200_v23 = vmax.f32 %v197_v21, 0.0 }
 0x1c0   :  { %340 = vmatpush3.msra.mxu1 %v200_v23 }
 0x1c1   :  { %342 = vmatmul.mubr.msk.f32.vlgmr.msra.gmra.mrb[2].mxu1 %vm212_vm3, %v201_v24 }
 0x294   :  { %v282_v30 = vpop.f32.mrb[2].mxu1 }
 0x295   :  { %v283_v31 = vadd.f32 %v282_v30, %v211_v29  ;;  %v343_v32 = vpop.f32.mrb[3].mxu1 }
 0x297   :  { %v313_v33 = vmul.f32 -1.442695, %v283_v31 }
 0x299   :  { %356 = vpow2.f32 %v313_v33 }
 0x2a3   :  { %v357_v34 = vpop.eup %356 }
 0x2a4   :  { %v289_v35 = vadd.f32 1.0, %v357_v34 }
 0x2a6   :  { %358 = vrcp.f32 %v289_v35 }
 0x2b0   :  { %v359_v36 = vpop.eup %358 }
 0x2b1   :  { %293 = vst.msk [vmem:[#allocation3] sm:$0x1] %vm292_vm4, %v359_v36 }
 0x2b2   :  { %371 = shalt.err (!%p368_p4)
}
 0x2b3   :  { %s372_s20 = scalar_lea.hbm %s481_s7, 16 }
 0x2b4   :  { %p373_p5 = scmp.ne.s32.totalorder %s481_s7, %s372_s20  ;;  %p376_p6 = scmp.lt.u32.totalorder %s372_s20, %s481_s7 }
 0x2b6   :  { %p378_p7 = pnand %p376_p6, %p373_p5 }
 0x2b8   :  { %381 = shalt.err (!%p378_p7)
}
 0x2b9   :  { %303 = dma.vmem_to_hbm [thread:$0]  %s301_s16, 16, %s481_s7, [#allocation4]  }
 0x2ba   :  { %382 = dma.done.wait [#allocation4], 16  }
 0x2bb   :  { %383 = vsyncadd [#allocation4], 4294967280 }
 0x2bc   :  { %307 = vsyncpa [#allocation4], 1 }

</bundles_post_ra>
